<compile_context>
chip_gen: v7x
topology: tpu7x:2x2x1
jax: 0.10.0
libtpu: 0.0.40
codegen_flags: <defaults>
</compile_context>

<pallas_src>
import functools
import math

import jax
import jax.numpy as jnp
from jax.experimental import pallas as pl
from jax.experimental.pallas import tpu as pltpu


# -----------------------------------------------------------------------------
# Kernel
# -----------------------------------------------------------------------------
def linear_embedding_kernel(x_ref, w_ref, b_ref, gamma_ref, beta_ref, pe_ref,
                            o_ref, *, matmul_dtype):
    """One S-tile: Linear -> BatchNorm1d (training stats) -> ReLU -> +pe.

      x_ref     : (B, tS, In)   pipelined input tile (channel axis tiled)
      w_ref     : (In, D)       resident weights
      b_ref     : (1, D)        resident bias
      gamma_ref : (S, 1)        resident BN weight (full channel axis)
      beta_ref  : (S, 1)        resident BN bias
      pe_ref    : (S, D)        resident positional embedding
      o_ref     : (B, tS, D)    pipelined output tile

    BN channel axis is dim 1; stats are per-channel over (batch, feature),
    so every S-tile is self-contained.
    """
    B, tS, In = x_ref.shape
    D = w_ref.shape[1]
    j = pl.program_id(0)
    off = pl.multiple_of(j * tS, 8)          # sublane-aligned offset into the S axis

    # ---- Linear: one M-heavy (B*tS, In) x (In, D) matmul on the MXU ----------
    # (B, tS) -> rows is a free view: tS % 8 == 0 (sublane aligned) and In is the
    # full trailing dim, so no relayout is introduced.
    x2 = x_ref[...].reshape(B * tS, In)
    w = w_ref[...]
    if matmul_dtype != jnp.float32:
        # bf16 operands: MXU fast path on v6e/v7x, halves operand vreg/VMEM traffic.
        x2 = x2.astype(matmul_dtype)
        w = w.astype(matmul_dtype)
    y2 = jnp.dot(x2, w, preferred_element_type=jnp.float32)      # (B*tS, D) f32
    y2 = y2 + b_ref[...]                                         # + (1, D)
    y = y2.reshape(B, tS, D)                                     # free split

    # ---- BatchNorm1d(out_size), training-mode batch statistics ---------------
    # One-pass sum / sum-of-squares, folded into a per-channel scale a / shift c.
    n = jnp.float32(B * D)
    s1 = jnp.sum(y, axis=(0, 2), keepdims=True)                  # (1, tS, 1)
    s2 = jnp.sum(y * y, axis=(0, 2), keepdims=True)              # (1, tS, 1)
    mean = s1 / n
    var = jnp.maximum(s2 / n - mean * mean, 0.0)                 # biased var, clamp >= 0
    inv_std = jax.lax.rsqrt(var + 1e-5)
    gamma = gamma_ref[pl.ds(off, tS), :][None, :, :]             # (1, tS, 1)
    beta = beta_ref[pl.ds(off, tS), :][None, :, :]               # (1, tS, 1)
    a = gamma * inv_std
    c = beta - mean * a

    # ---- ReLU then + PositionalEmbedding (broadcast over batch) --------------
    pe = pe_ref[pl.ds(off, tS), :][None, :, :]                   # (1, tS, D)
    # TODO(synk): if production out_size stays < 128, a lane-dense output layout
    # (group 128//D channels into the lane axis) would densify the store path;
    # skipped here because it turns the BN reduce into a segmented in-lane reduce.
    o_ref[...] = jnp.maximum(y * a + c, 0.0) + pe


# -----------------------------------------------------------------------------
# Positional embedding (identical math to PositionalEmbedding.__init__)
# -----------------------------------------------------------------------------
def make_positional_embedding(seq_len, d_model):
    position = jnp.arange(seq_len, dtype=jnp.float32)[:, None]                     # (S, 1)
    div_term = jnp.exp(
        jnp.arange(0, d_model, 2, dtype=jnp.float32) * -(math.log(10000.0) / d_model)
    )                                                                              # (d_model//2,)
    ang = position * div_term                                                      # (S, d_model//2)
    pe = jnp.zeros((seq_len, d_model), jnp.float32)
    pe = pe.at[:, 0::2].set(jnp.sin(ang))
    pe = pe.at[:, 1::2].set(jnp.cos(ang))
    return pe


# -----------------------------------------------------------------------------
# Hardware detection & padding-aware VMEM accounting
# -----------------------------------------------------------------------------
def _tpu_hw_info():
    """(physical VMEM bytes per TensorCore, TensorCores per chip)."""
    kind = ""
    try:
        kind = jax.devices()[0].device_kind.lower()
    except Exception:
        pass
    n_tc = 2 if "v7" in kind else 1
    vmem = (64 << 20) if "v7" in kind else (128 << 20)
    try:
        vmem = int(pltpu.get_tpu_info().vmem_capacity_bytes)
    except Exception:
        pass
    return vmem, n_tc


def _default_matmul_dtype():
    """bf16 MXU operands (f32 accumulate) on v6e/v7x; f32 on v5e / unknown."""
    try:
        kind = jax.devices()[0].device_kind.lower()
    except Exception:
        return jnp.float32
    if "v6" in kind or "v7" in kind:
        return jnp.bfloat16
    return jnp.float32


def _round_up(x, m):
    return -(-x // m) * m


def _vmem_bytes(B, tS, in_size, D, S, d_model):
    """Padding-aware VMEM footprint (f32) of one pipelined step.

    Mosaic pads the trailing dim of every VMEM buffer to 128 lanes and the
    second-to-last dim to 8 sublanes, so narrow dims (in_size=16, D=32, the
    (S,1) gamma/beta) occupy far more than their nominal bytes.  In-kernel
    intermediates (matmul result, y*y, cast temporaries) share the same scoped
    VMEM and are budgeted at ~3x the output tile.
    """
    in_pad = _round_up(in_size, 128)
    d_pad = _round_up(D, 128)
    dm_pad = _round_up(d_model, 128)
    s_pad = _round_up(S, 8)
    tiles = 2 * B * tS * (in_pad + d_pad) * 4                # double-buffered x + out tiles
    resident = (_round_up(in_size, 8) * d_pad                # w
                + 8 * d_pad                                  # b (1, D)
                + 2 * s_pad * 128                            # gamma, beta (S, 1)
                + s_pad * dm_pad) * 4                        # pe (S, d_model)
    intermediates = 3 * B * tS * d_pad * 4                   # y, y*y, temporaries
    return tiles + resident + intermediates


def _select_tile_s(S, B, in_size, D, d_model, *, vmem_budget_bytes, min_tiles=1):
    """Largest multiple-of-8 divisor of S whose padded footprint fits the budget.

    min_tiles >= 2 forces a multi-step grid (v7x megacore: two TensorCores split
    the 'parallel' S axis), preferring an even number of grid steps.
    """
    if S % 8 != 0:
        need = _vmem_bytes(B, S, in_size, D, S, d_model)
        if need > vmem_budget_bytes:
            raise ValueError(
                "LinearEmbedding kernel: S is not a multiple of 8 and the single "
                f"full-extent tile needs {need} bytes of VMEM (> budget "
                f"{vmem_budget_bytes}).")
        return S  # single full-extent block (still correct)
    divisors = [t for t in range(8, S + 1, 8) if S % t == 0]
    candidates = [t for t in divisors if S // t >= min_tiles] or [min(divisors)]
    fitting = [t for t in candidates
               if _vmem_bytes(B, t, in_size, D, S, d_model) <= vmem_budget_bytes]
    if not fitting:
        # TODO(synk): for very large batch even tS=8 overflows VMEM; the fix is to
        # tile B with a two-pass BatchNorm (accumulate per-channel s1/s2 in VMEM
        # scratch across an 'arbitrary' B grid axis, finalize on the last step).
        smallest = min(candidates)
        raise ValueError(
            "LinearEmbedding kernel: even the smallest S-tile "
            f"(tile_s={smallest}, B={B}) needs "
            f"{_vmem_bytes(B, smallest, in_size, D, S, d_model)} bytes of VMEM, "
            f"more than the budget of {vmem_budget_bytes} bytes.")
    if min_tiles >= 2:
        even = [t for t in fitting if (S // t) % 2 == 0]
        if even:
            return max(even)
    return max(fitting)


# -----------------------------------------------------------------------------
# Forward wrapper
# -----------------------------------------------------------------------------
def linear_embedding_forward(x, w, b, gamma, beta, *, in_size, d_model,
                             tile_s=None, matmul_dtype=None):
    """x: (B, S, F) float32.  w: (in_size, out_size).  Returns (B, S, out_size) f32.

    matmul_dtype=None auto-selects bf16 MXU operands on v6e/v7x (f32 accumulate)
    and f32 elsewhere; pass jnp.float32 for a bit-faithful f32 matmul.
    """
    B, S, F = x.shape
    D = w.shape[1]

    # Feature-axis pad / truncate to in_size (glue, same as F.pad / slicing).
    if F < in_size:
        x = jnp.pad(x, ((0, 0), (0, 0), (0, in_size - F)))
    elif F > in_size:
        x = x[:, :, :in_size]

    assert S == D, "BatchNorm1d(out_size) on a (B, S, out) tensor requires S == out_size"
    assert d_model == D, "pe broadcast requires d_model == out_size"

    pe = make_positional_embedding(S, d_model)                    # (S, d_model)

    vmem_phys, n_tc = _tpu_hw_info()
    # Scoped-VMEM ceiling we are willing to request: ~100 MiB on 128 MiB parts
    # (v5e/v6e), ~56 MiB on v7x's 64 MiB-per-TC VMEM.
    max_vmem_limit = min(vmem_phys - (8 << 20), 100 << 20)

    if matmul_dtype is None:
        matmul_dtype = _default_matmul_dtype()

    if tile_s is None:
        # v7x: keep >= 2 (preferably even) grid steps so the 'parallel' axis is
        # actually split across both TensorCores; single-TC chips take the
        # largest tile (fewest steps) that fits.
        min_tiles = 2 if (n_tc >= 2 and S % 8 == 0 and S >= 16) else 1
        tile_s = _select_tile_s(S, B, in_size, D, d_model,
                                vmem_budget_bytes=max_vmem_limit,
                                min_tiles=min_tiles)
    assert S % tile_s == 0
    assert tile_s % 8 == 0 or tile_s == S

    est_bytes = _vmem_bytes(B, tile_s, in_size, D, S, d_model)
    cp_kwargs = dict(dimension_semantics=("parallel",))   # v7x: shard S-tiles over 2 TCs
    if est_bytes > (12 << 20):   # above the conservative v5e scoped default
        cp_kwargs["vmem_limit_bytes"] = int(
            min(max(est_bytes * 5 // 4, 16 << 20), max_vmem_limit))

    grid = (S // tile_s,)
    kernel = functools.partial(linear_embedding_kernel, matmul_dtype=matmul_dtype)

    out = pl.pallas_call(
        kernel,
        out_shape=jax.ShapeDtypeStruct((B, S, D), jnp.float32),
        grid=grid,
        in_specs=[
            pl.BlockSpec((B, tile_s, in_size), lambda j: (0, j, 0)),   # x     (tiled on S)
            pl.BlockSpec((in_size, D), lambda j: (0, 0)),              # w     (resident)
            pl.BlockSpec((1, D), lambda j: (0, 0)),                    # bias  (resident)
            pl.BlockSpec((S, 1), lambda j: (0, 0)),                    # gamma (resident)
            pl.BlockSpec((S, 1), lambda j: (0, 0)),                    # beta  (resident)
            pl.BlockSpec((S, d_model), lambda j: (0, 0)),              # pe    (resident)
        ],
        out_specs=pl.BlockSpec((B, tile_s, D), lambda j: (0, j, 0)),
        compiler_params=pltpu.CompilerParams(**cp_kwargs),
    )(x, w, b.reshape(1, D), gamma.reshape(S, 1), beta.reshape(S, 1), pe)
    return out


# -----------------------------------------------------------------------------
# Pure-JAX reference (training-mode BatchNorm, biased variance, eps=1e-5)
# -----------------------------------------------------------------------------
def reference_forward(x, w, b, gamma, beta, *, in_size, d_model):
    B, S, F = x.shape
    if F < in_size:
        x = jnp.pad(x, ((0, 0), (0, 0), (0, in_size - F)))
    elif F > in_size:
        x = x[:, :, :in_size]
    y = jnp.einsum("bsi,id->bsd", x, w) + b[None, None, :]
    mean = jnp.mean(y, axis=(0, 2), keepdims=True)
    var = jnp.mean((y - mean) ** 2, axis=(0, 2), keepdims=True)
    y = (y - mean) / jnp.sqrt(var + 1e-5)
    y = y * gamma[None, :, None] + beta[None, :, None]
    y = jnp.maximum(y, 0.0)
    return y + make_positional_embedding(S, d_model)[None]


if __name__ == "__main__":
    # Shapes implied by the module: out_size == d_model == S (dim 1 of x).
    B = 2
    in_size = 16
    out_size = 32
    d_model = 32
    S = out_size

    key = jax.random.PRNGKey(0)
    kx, kw, kb = jax.random.split(key, 3)

    x = jax.random.normal(kx, (B, S, in_size), dtype=jnp.float32)

    # Deterministic parameter init (PyTorch nn.Linear-style uniform bounds).
    bound = 1.0 / math.sqrt(in_size)
    w = jax.random.uniform(kw, (in_size, out_size), jnp.float32, -bound, bound)
    b = jax.random.uniform(kb, (out_size,), jnp.float32, -bound, bound)
    # BatchNorm1d default affine params.
    gamma = jnp.ones((out_size,), jnp.float32)
    beta = jnp.zeros((out_size,), jnp.float32)

    # TODO(synk): PyTorch BatchNorm1d also updates running_mean/running_var in
    # training; those buffers are not produced here (forward output only).

    ref = reference_forward(x, w, b, gamma, beta, in_size=in_size, d_model=d_model)

    # 1) Multi-tile f32 path (grid of 4 over the channel axis) — exercises the
    #    pipelining and the resident-param in-kernel pl.ds slicing.
    out_tiled = jax.block_until_ready(linear_embedding_forward(
        x, w, b, gamma, beta, in_size=in_size, d_model=d_model,
        tile_s=8, matmul_dtype=jnp.float32))
    assert out_tiled.shape == (B, S, out_size)
    assert jnp.allclose(out_tiled, ref, atol=2e-4, rtol=1e-4), "tiled kernel mismatch"

    # 2) Auto tile-size f32 path (padding-aware, generation-aware tile selection).
    out_auto = jax.block_until_ready(linear_embedding_forward(
        x, w, b, gamma, beta, in_size=in_size, d_model=d_model,
        matmul_dtype=jnp.float32))
    assert jnp.allclose(out_auto, ref, atol=2e-4, rtol=1e-4), "auto-tile kernel mismatch"

    # 3) Generation-default path: bf16 MXU operands on v6e/v7x (f32 accumulate),
    #    f32 elsewhere.  Looser tolerance covers bf16 operand rounding.
    auto_dtype = _default_matmul_dtype()
    out_fast = jax.block_until_ready(linear_embedding_forward(
        x, w, b, gamma, beta, in_size=in_size, d_model=d_model))
    if auto_dtype == jnp.float32:
        assert jnp.allclose(out_fast, ref, atol=2e-4, rtol=1e-4), "default kernel mismatch"
    else:
        assert jnp.allclose(out_fast, ref, atol=5e-2, rtol=5e-2), "bf16 kernel mismatch"

    print("KERNEL_OK")
</pallas_src>

<mosaic_0001>
module attributes {stable_mosaic.version = 11 : i64} {
  func.func @linear_embedding_kernel(%arg0: i32, %arg1: memref<2x8x16xf32, #tpu.memory_space<vmem>>, %arg2: memref<16x32xf32, #tpu.memory_space<vmem>>, %arg3: memref<1x32xf32, #tpu.memory_space<vmem>>, %arg4: memref<32x1xf32, #tpu.memory_space<vmem>>, %arg5: memref<32x1xf32, #tpu.memory_space<vmem>>, %arg6: memref<32x32xf32, #tpu.memory_space<vmem>>, %arg7: memref<2x8x32xf32, #tpu.memory_space<vmem>>) attributes {dimension_semantics = [#tpu.dimension_semantics<parallel>], iteration_bounds = array<i64: 4>, scalar_prefetch = 0 : i64, scratch_operands = 0 : i64, tpu.core_type = #tpu.core_type<tc>, window_params = [{transform_indices = @transform_0, window_bounds = array<i64: 2, 8, 16>}, {pipeline_mode = #tpu.pipeline_mode<synchronous>, transform_indices = @transform_1, window_bounds = array<i64: 16, 32>}, {pipeline_mode = #tpu.pipeline_mode<synchronous>, transform_indices = @transform_2, window_bounds = array<i64: 1, 32>}, {pipeline_mode = #tpu.pipeline_mode<synchronous>, transform_indices = @transform_3, window_bounds = array<i64: 32, 1>}, {pipeline_mode = #tpu.pipeline_mode<synchronous>, transform_indices = @transform_4, window_bounds = array<i64: 32, 1>}, {pipeline_mode = #tpu.pipeline_mode<synchronous>, transform_indices = @transform_5, window_bounds = array<i64: 32, 32>}, {transform_indices = @transform_6, window_bounds = array<i64: 2, 8, 32>}]} {
    %c8_i32 = arith.constant 8 : i32
    %0 = arith.muli %arg0, %c8_i32 : i32
    %1 = tpu.assume_multiple %0, 8 : i32
    %c0 = arith.constant 0 : index
    %c0_0 = arith.constant 0 : index
    %c0_1 = arith.constant 0 : index
    %2 = vector.load %arg1[%c0, %c0_0, %c0_1] : memref<2x8x16xf32, #tpu.memory_space<vmem>>, vector<2x8x16xf32>
    %3 = vector.shape_cast %2 : vector<2x8x16xf32> to vector<16x16xf32>
    %c0_2 = arith.constant 0 : index
    %c0_3 = arith.constant 0 : index
    %4 = vector.load %arg2[%c0_2, %c0_3] : memref<16x32xf32, #tpu.memory_space<vmem>>, vector<16x32xf32>
    %cst = arith.constant dense<0.000000e+00> : vector<16x32xf32>
    %5 = tpu.matmul %3, %4, %cst {dimension_numbers = #tpu.dot_dimension_numbers<[1], [0], [0], [1], [0, 0, 1, 1], [], []>} : vector<16x16xf32>, vector<16x32xf32>, vector<16x32xf32> -> vector<16x32xf32>
    %c0_4 = arith.constant 0 : index
    %c0_5 = arith.constant 0 : index
    %6 = vector.load %arg3[%c0_4, %c0_5] : memref<1x32xf32, #tpu.memory_space<vmem>>, vector<1x32xf32>
    %7 = vector.broadcast %6 : vector<1x32xf32> to vector<16x32xf32>
    %8 = arith.addf %5, %7 : vector<16x32xf32>
    %9 = vector.shape_cast %8 : vector<16x32xf32> to vector<2x8x32xf32>
    %cst_6 = arith.constant dense<0.000000e+00> : vector<8xf32>
    %10 = vector.multi_reduction <add>, %9, %cst_6 [0, 2] : vector<2x8x32xf32> to vector<8xf32>
    %11 = vector.shape_cast %10 : vector<8xf32> to vector<1x8x1xf32>
    %12 = arith.mulf %9, %9 : vector<2x8x32xf32>
    %cst_7 = arith.constant dense<0.000000e+00> : vector<8xf32>
    %13 = vector.multi_reduction <add>, %12, %cst_7 [0, 2] : vector<2x8x32xf32> to vector<8xf32>
    %14 = vector.shape_cast %13 : vector<8xf32> to vector<1x8x1xf32>
    %cst_8 = arith.constant 6.400000e+01 : f32
    %15 = vector.broadcast %cst_8 : f32 to vector<1x8x1xf32>
    %16 = arith.divf %11, %15 : vector<1x8x1xf32>
    %cst_9 = arith.constant 6.400000e+01 : f32
    %17 = vector.broadcast %cst_9 : f32 to vector<1x8x1xf32>
    %18 = arith.divf %14, %17 : vector<1x8x1xf32>
    %19 = arith.mulf %16, %16 : vector<1x8x1xf32>
    %20 = arith.subf %18, %19 : vector<1x8x1xf32>
    %cst_10 = arith.constant 0.000000e+00 : f32
    %21 = vector.broadcast %cst_10 : f32 to vector<1x8x1xf32>
    %22 = arith.maximumf %20, %21 : vector<1x8x1xf32>
    %cst_11 = arith.constant 9.99999974E-6 : f32
    %23 = vector.broadcast %cst_11 : f32 to vector<1x8x1xf32>
    %24 = arith.addf %22, %23 : vector<1x8x1xf32>
    %25 = math.rsqrt %24 : vector<1x8x1xf32>
    %26 = arith.index_cast %1 : i32 to index
    %c0_12 = arith.constant 0 : index
    %27 = vector.load %arg4[%26, %c0_12] : memref<32x1xf32, #tpu.memory_space<vmem>>, vector<8x1xf32>
    %28 = vector.shape_cast %27 : vector<8x1xf32> to vector<1x8x1xf32>
    %29 = arith.index_cast %1 : i32 to index
    %c0_13 = arith.constant 0 : index
    %30 = vector.load %arg5[%29, %c0_13] : memref<32x1xf32, #tpu.memory_space<vmem>>, vector<8x1xf32>
    %31 = vector.shape_cast %30 : vector<8x1xf32> to vector<1x8x1xf32>
    %32 = arith.mulf %28, %25 : vector<1x8x1xf32>
    %33 = arith.mulf %16, %32 : vector<1x8x1xf32>
    %34 = arith.subf %31, %33 : vector<1x8x1xf32>
    %35 = arith.index_cast %1 : i32 to index
    %c0_14 = arith.constant 0 : index
    %36 = vector.load %arg6[%35, %c0_14] : memref<32x32xf32, #tpu.memory_space<vmem>>, vector<8x32xf32>
    %37 = vector.shape_cast %36 : vector<8x32xf32> to vector<1x8x32xf32>
    %38 = vector.broadcast %32 : vector<1x8x1xf32> to vector<2x8x32xf32>
    %39 = arith.mulf %9, %38 : vector<2x8x32xf32>
    %40 = vector.broadcast %34 : vector<1x8x1xf32> to vector<2x8x32xf32>
    %41 = arith.addf %39, %40 : vector<2x8x32xf32>
    %cst_15 = arith.constant 0.000000e+00 : f32
    %42 = vector.broadcast %cst_15 : f32 to vector<2x8x32xf32>
    %43 = arith.maximumf %41, %42 : vector<2x8x32xf32>
    %44 = vector.broadcast %37 : vector<1x8x32xf32> to vector<2x8x32xf32>
    %45 = arith.addf %43, %44 : vector<2x8x32xf32>
    %c0_16 = arith.constant 0 : index
    %c0_17 = arith.constant 0 : index
    %c0_18 = arith.constant 0 : index
    %46 = vector.load %arg7[%c0_16, %c0_17, %c0_18] : memref<2x8x32xf32, #tpu.memory_space<vmem>>, vector<2x8x32xf32>
    tpu.vector_store %arg7[%c0_16, %c0_17, %c0_18], %45 {strides = array<i32>} : memref<2x8x32xf32, #tpu.memory_space<vmem>>, vector<2x8x32xf32>,
    return
  }
  func.func @transform_0(%arg0: i32) -> (i32, i32, i32) {
    %c0_i32 = arith.constant 0 : i32
    %c0_i32_0 = arith.constant 0 : i32
    %c0_i32_1 = arith.constant 0 : i32
    return %c0_i32, %arg0, %c0_i32_0 : i32, i32, i32
  }
  func.func @transform_1(%arg0: i32) -> (i32, i32) {
    %c0_i32 = arith.constant 0 : i32
    %c0_i32_0 = arith.constant 0 : i32
    %c0_i32_1 = arith.constant 0 : i32
    return %c0_i32, %c0_i32_0 : i32, i32
  }
  func.func @transform_2(%arg0: i32) -> (i32, i32) {
    %c0_i32 = arith.constant 0 : i32
    %c0_i32_0 = arith.constant 0 : i32
    %c0_i32_1 = arith.constant 0 : i32
    return %c0_i32, %c0_i32_0 : i32, i32
  }
  func.func @transform_3(%arg0: i32) -> (i32, i32) {
    %c0_i32 = arith.constant 0 : i32
    %c0_i32_0 = arith.constant 0 : i32
    %c0_i32_1 = arith.constant 0 : i32
    return %c0_i32, %c0_i32_0 : i32, i32
  }
  func.func @transform_4(%arg0: i32) -> (i32, i32) {
    %c0_i32 = arith.constant 0 : i32
    %c0_i32_0 = arith.constant 0 : i32
    %c0_i32_1 = arith.constant 0 : i32
    return %c0_i32, %c0_i32_0 : i32, i32
  }
  func.func @transform_5(%arg0: i32) -> (i32, i32) {
    %c0_i32 = arith.constant 0 : i32
    %c0_i32_0 = arith.constant 0 : i32
    %c0_i32_1 = arith.constant 0 : i32
    return %c0_i32, %c0_i32_0 : i32, i32
  }
  func.func @transform_6(%arg0: i32) -> (i32, i32, i32) {
    %c0_i32 = arith.constant 0 : i32
    %c0_i32_0 = arith.constant 0 : i32
    %c0_i32_1 = arith.constant 0 : i32
    return %c0_i32, %arg0, %c0_i32_0 : i32, i32, i32
  }
}

</mosaic_0001>

<bundles_post_ra>
// kernel: tpu_custom_call.1
= control target key start
LH: loop header
LB: loop body
LE: loop exit
PB: predicated region body
PF: predicated region fallthrough
CT: control target
= control target key end

     0   :  { %11 = vsyncpa [#allocation4], 0  ;;  %s839_s0 = inlined_call_operand.vmem [shape: f32[2,32,16], index: 0, kind: input, shape index: {}]   ;;  %s840_s1 = inlined_call_operand.vmem [shape: f32[16,32], index: 1, kind: input, shape index: {}]   ;;  %s841_s2 = inlined_call_operand.vmem [shape: f32[1,32], index: 2, kind: input, shape index: {}]   ;;  %s842_s3 = inlined_call_operand.vmem [shape: f32[32,1], index: 3, kind: input, shape index: {}]   ;;  %s843_s4 = inlined_call_operand.vmem [shape: f32[32,1], index: 4, kind: input, shape index: {}]   ;;  %s844_s5 = inlined_call_operand.vmem [shape: f32[32,32], index: 5, kind: input, shape index: {}]   ;;  %s845_s6 = inlined_call_operand.hbm [shape: f32[2,32,32], index: 6, kind: output, shape index: {}]  }
   0x1   :  { %13 = vsyncpa [#allocation4 + $0x1], 0  ;;  %s701_s21 = smov 0   ;;  %s703_s22 = smov 0  }
   0x2   :  { %s705_s23 = smov 0   ;;  %s707_s24 = smov 0  }
   0x3 LB: > { %s722_s25 = sadd.s32 4294967295, %s659_s24   ;;  %s519_s26 = sadd.s32 4294967294, %s659_s24   ;;  %s659_s24 = sphi %s707_s24, %s851_s24   ;;  %s655_s23 = sphi %s705_s23, %s850_s23   ;;  %s651_s22 = sphi %s703_s22, %s849_s22   ;;  %s647_s21 = sphi %s701_s21, %s848_s21  }
   0x4   : > { %s726_s27 = sadd.s32 1, %s659_s24   ;;  %s26_s28 = sadd.s32 1, %s655_s23 }
   0x5   : > { %s23_s29 = ssub.s32 %s659_s24, %s726_s27  ;;  %p33_p0 = scmp.ne.s32.totalorder %s655_s23, %s651_s22 }
   0x6   : > { %p24_p1 = scmp.eq.s32.totalorder %s23_s29, 0  ;;  %p34_p2 = scmp.eq.s32.totalorder %s659_s24, 0 }
   0x7   : > { %p168_p3 = scmp.eq.s32.totalorder %s722_s25, 3  ;;  %p173_p4 = scmp.ne.s32.totalorder %s651_s22, %s647_s21 }
   0x8   : > { %s738_s30 = scalar_select %p24_p1, %s655_s23, %s26_s28  }
   0x9   : > { %p35_p5 = por %p34_p2, %p33_p0  ;;  %p740_p6 = por %p168_p3, %p33_p0 }
   0xa   : > { %p174_p7 = scmp.eq.s32.totalorder %s519_s26, 3  ;;  %p521_p9 = scmp.ge.s32.totalorder %s659_s24, 4 }
   0xc   : > { %p744_p8 = por %p174_p7, %p173_p4  ;;  %205 = sbr.rel (%p521_p9) target bundleno = 26 (0x1a), region = 36 }
  0x13   : > { %208 = sbr.rel (!%p35_p5) target bundleno = 26 (0x1a), region = 40  ;;  %s210_s9 = sand.u32 (%p35_p5), 1, %s655_s23  }
  0x14   : > { %s523_s10 = sshll.u32 (%p35_p5), %s659_s24, 3  ;;  %s522_s11 = sshll.u32 (%p35_p5), %s210_s9, 4 }
  0x15   : > { %s214_s14 = scalar_lea.vmem (%p35_p5), %s839_s0, %s523_s10  ;;  %s212_s15 = scalar_lea.vmem (%p35_p5), [#allocation2], %s522_s11 }
  0x16   : > { %v244_v0 = vld [vmem:[%s214_s14] sm:$0xff] (%p35_p5) }
  0x17   : > { %v246_v1 = vld [vmem:[%s214_s14 + $0x20] sm:$0xff] (%p35_p5)  ;;  %245 = vst [vmem:[%s212_s15] sm:$0xff] (%p35_p5), %v244_v0 }
  0x18   : > { %247 = vst [vmem:[%s212_s15 + $0x8] sm:$0xff] (%p35_p5), %v246_v1 }
  0x1a PF: > { %p524_p10 = scmp.ge.s32.totalorder %s659_s24, 1  ;;  %p252_p11 = scmp.lt.s32.totalorder %s659_s24, 5 }
  0x1c   : > { %p253_p12 = pnand %p524_p10, %p252_p11 }
  0x1d   : > { %v291_v2 = vld [vmem:[%s840_s1] sm:$0xff] (!%p253_p12)  ;;  %v292_v3 = vld [vmem:[%s840_s1 + $0x8] sm:$0xff] (!%p253_p12)  ;;  %s259_s20 = sand.u32 (!%p253_p12), 1, %s651_s22   ;;  %vm300_vm0 = vcmask (!%p253_p12), 130048   ;;  %vm382_vm1 = vcmask (!%p253_p12), 261120   ;;  %v661_v20 = vmov (!%p253_p12), 0  }
  0x1e   : > { %256 = sbr.rel (%p253_p12) target bundleno = 575 (0x23f), region = 78  ;;  %v546_v4 = vpack.c.bf16 (!%p253_p12), %v292_v3, %v291_v2  ;;  %s765_s26 = sshll.u32 (!%p253_p12), %s259_s20, 4  ;;  %v528_v7 = vld [vmem:[%s841_s2] ss:$0 sm:$0xff] (!%p253_p12)  ;;  %593 = vset.pattern.permute.xlu1 (!%p253_p12), %v661_v20  ;;  %594 = vset.pattern.permute.xlu0 (!%p253_p12), %v661_v20 }
  0x1f   : > { %s261_s28 = scalar_lea.vmem (!%p253_p12), [#allocation2], %s765_s26  ;;  %s527_s10 = sshll.u32 (!%p253_p12), %s722_s25, 3 }
  0x20   : > { %547 = vmatprep.subr.bf16.mxu0 (!%p253_p12), %v546_v4  ;;  %v289_v5 = vld [vmem:[%s261_s28] sm:$0xff] (!%p253_p12)  ;;  %v290_v6 = vld [vmem:[%s261_s28 + $0x8] sm:$0xff] (!%p253_p12)  ;;  %s403_s13 = scalar_lea.vmem (!%p253_p12), %s842_s3, %s527_s10  ;;  %s405_s16 = scalar_lea.vmem (!%p253_p12), %s843_s4, %s527_s10 }
  0x21   : > { %549 = vmatpush3.bf16.msra.mxu0 (!%p253_p12), %v546_v4  ;;  %543 = vmatprep.mubr.msk.f32.mxu0 (!%p253_p12), %vm300_vm0, %v289_v5  ;;  %v404_v29 = vld [vmem:[%s403_s13] sm:$0xff] (!%p253_p12)  ;;  %s410_s19 = scalar_lea.vmem (!%p253_p12), %s844_s5, %s527_s10  ;;  %s287_s28 = scalar_lea.vmem (!%p253_p12), [#allocation3], %s765_s26 }
  0x22   : > { %v406_v32 = vld [vmem:[%s405_s16] sm:$0xff] (!%p253_p12)  ;;  %s445_s29 = sshll.u32 (!%p253_p12), %s287_s28, 4  ;;  %s532_s9 = sshll.u32 (!%p253_p12), %s722_s25, 7  ;;  %s787_s29 = int_to_ptr.vmem [resolvable:$true] %s445_s29 }
  0x23   : > { %v411_v41 = vld [vmem:[%s410_s19] sm:$0xff] (!%p253_p12)  ;;  %s792_s10 = scalar_lea.hbm (!%p253_p12), %s845_s6, %s532_s9  ;;  %s798_s25 = scalar_lea.sflag (!%p253_p12), [#allocation4], %s259_s20 }
  0x24   : > { %544 = vmatmul.mubr.msk.f32.vlgmr.msra.gmra.mrb[0].mxu0 (!%p253_p12), %vm300_vm0, %v290_v6  ;;  %s597_s26 = scalar_lea.vmem (!%p253_p12), %s787_s29, 256  ;;  %s662_s13 = smov (!%p253_p12), [#allocation3]  }
  0x25   : > { %p598_p13 = scmp.ne.s32.totalorder %s787_s29, %s597_s26  ;;  %s601_s14 = sshll.u32 %s662_s13, 4  ;;  %s602_s14 = int_to_ptr.vmem [resolvable:$false] %s601_s14 }
  0x26   : > { %s603_s15 = scalar_lea.vmem %s602_s14, 512  ;;  %p604_p2 = scmp.lt.s32.totalorder %s787_s29, %s602_s14 }
  0x27   : > { %p599_p0 = pnand %p598_p13, %p740_p6  ;;  %p605_p3 = scmp.lt.s32.totalorder %s603_s15, %s597_s26 }
  0x29   : > { %p600_p1 = pneg %p599_p0  ;;  %p606_p4 = por %p605_p3, %p604_p2 }
  0x2b   : > { %p607_p5 = pnand %p606_p4, %p600_p1 }
  0xf7   : > { %v545_v8 = vpop.f32.mrb[0].mxu0 }
  0xf8   : > { %v379_v9 = vadd.f32 %v545_v8, %v528_v7  ;;  %v373_v10 = vpop.f32.mrb[1].mxu0 }
  0xf9   : > { %v374_v11 = vadd.f32 %v528_v7, %v373_v10 }
  0xfa   : > { %v384_v12 = vsel %vm382_vm1, %v379_v9, 0.0  ;;  %v389_v13 = vmul.f32 %v379_v9, %v379_v9 }
  0xfb   : > { %v383_v14 = vsel %vm382_vm1, %v374_v11, 0.0  ;;  %v388_v15 = vmul.f32 %v374_v11, %v374_v11 }
  0xfc   : > { %v385_v16 = vadd.f32 %v384_v12, %v383_v14  ;;  %v391_v18 = vsel %vm382_vm1, %v389_v13, 0.0 }
  0xfd   : > { %v390_v17 = vsel %vm382_vm1, %v388_v15, 0.0 }
  0xfe   : > { %386 = vadd.xlane.f32.xlu0 %v385_v16  ;;  %v392_v19 = vadd.f32 %v391_v18, %v390_v17 }
 0x102   : > { %393 = vadd.xlane.f32.xlu0 %v392_v19 }
 0x18b   : > { %v387_v21 = vpop.xlane.xlu0 %386 }
 0x18c   : > { %v396_v22 = vmul.f32 0.015625, %v387_v21 }
 0x18e   : > { %v398_v24 = vmul.f32 %v396_v22, %v396_v22 }
 0x18f   : > { %v394_v23 = vpop.xlane.xlu0 %393 }
 0x190   : > { %v397_v25 = vmul.f32 0.015625, %v394_v23 }
 0x192   : > { %v399_v26 = vsub.f32 %v397_v25, %v398_v24 }
 0x194   : > { %v400_v27 = vmax.f32 %v399_v26, 0.0 }
 0x196   : > { %v401_v28 = vadd.f32 1e-05, %v400_v27 }
 0x198   : > { %595 = vrsqrt.f32 %v401_v28 }
 0x1a2   : > { %v596_v30 = vpop.eup %595 }
 0x1a3   : > { %v407_v31 = vmul.f32 %v596_v30, %v404_v29 }
 0x1a5   : > { %414 = vperm.xlu1 %593, %v407_v31   ;;  %v408_v33 = vmul.f32 %v407_v31, %v396_v22 }
 0x1a7   : > { %v409_v34 = vsub.f32 %v406_v32, %v408_v33 }
 0x1a9   : > { %421 = vperm.xlu1 %593, %v409_v34  }
 0x224   : > { %v415_v35 = vpop.permute.xlu1 %414 }
 0x225   : > { %v417_v36 = vmul.f32 %v415_v35, %v374_v11  ;;  %v418_v37 = vmul.f32 %v415_v35, %v379_v9 }
 0x228   : > { %v422_v38 = vpop.permute.xlu1 %421 }
 0x229   : > { %v424_v39 = vadd.f32 %v422_v38, %v417_v36  ;;  %v425_v40 = vadd.f32 %v422_v38, %v418_v37 }
 0x22b   : > { %v426_v42 = vmax.f32 %v424_v39, 0.0  ;;  %v427_v43 = vmax.f32 %v425_v40, 0.0 }
 0x22d   : > { %v428_v44 = vadd.f32 %v426_v42, %v411_v41  ;;  %v429_v45 = vadd.f32 %v427_v43, %v411_v41 }
 0x22f   : > { %430 = vst.msk [vmem:[%s287_s28] sm:$0xff] %vm382_vm1, %v428_v44  ;;  %431 = vst.msk [vmem:[%s287_s28 + $0x8] sm:$0xff] %vm382_vm1, %v429_v45 }
 0x230   : > { %610 = shalt.err (!%p607_p5)
}
 0x231   : > { %s611_s20 = scalar_lea.hbm %s792_s10, 256  ;;  %s615_s18 = scalar_lea.hbm %s845_s6, 1024 }
 0x232   : > { %p612_p7 = scmp.ne.s32.totalorder %s792_s10, %s611_s20  ;;  %p616_p11 = scmp.lt.u32.totalorder %s792_s10, %s845_s6 }
 0x233   : > { %p617_p12 = scmp.lt.u32.totalorder %s615_s18, %s611_s20  ;;  %p619_p0 = scmp.lt.u32.totalorder %s611_s20, %s792_s10 }
 0x234   : > { %p613_p9 = pnand %p612_p7, %p740_p6 }
 0x235   : > { %p618_p13 = por %p617_p12, %p616_p11 }
 0x236   : > { %p614_p10 = pneg %p613_p9 }
 0x237   : > { %p620_p1 = por %p619_p0, %p618_p13 }
 0x239   : > { %p621_p2 = pnand %p620_p1, %p614_p10 }
 0x23b   : > { %624 = shalt.err (!%p621_p2)
}
 0x23c   : > { %s663_s9 = smov 128   ;;  %s664_s11 = smov 512  }
 0x23d   : > { %s665_s12 = smov 8  }
 0x23e   : > { %550 = dma.vmem_to_hbm [thread:$0]  (%p740_p6), %s787_s29, 256, %s792_s10, %s798_s25, %s663_s9, %s664_s11, %s665_s12  }
 0x23f PF: > { %p556_p3 = scmp.ge.s32.totalorder %s659_s24, 2  ;;  %s460_s26 = sand.u32 1, %s647_s21  }
 0x240   : > { %s461_s13 = scalar_lea.sflag [#allocation4], %s460_s26 }
 0x241   : > { %p553_p4 = pnand %p556_p3, %p744_p8 }
 0x243   : > { %642 = dma.done.wait (!%p553_p4), %s461_s13, 256  }
 0x244   : > { %644 = vsyncadd (!%p553_p4), %s461_s13, 4294967040  ;;  %p16_p5 = scmp.ge.s32.totalorder %s726_s27, 6   ;;  %s848_s21 = smov %s651_s22 }
 0x245   : > { %s849_s22 = smov %s655_s23  ;;  %s850_s23 = smov %s738_s30 }
 0x246   : > { %s851_s24 = smov %s726_s27  ;;  %18 = sbr.rel (!%p16_p5) target bundleno = 3 (0x3), region = 125 }
 0x24d   :  { %466 = vsyncpa [#allocation4], 1 }
 0x24e   :  { %468 = vsyncpa [#allocation4 + $0x1], 1 }

</bundles_post_ra>
